<compile_context>
chip_gen: v7x
topology: tpu7x:2x2x1
jax: 0.10.0
libtpu: 0.0.40
codegen_flags: <defaults>
</compile_context>

<pallas_src>
import math

import jax
import jax.numpy as jnp
from jax.experimental import pallas as pl
from jax.experimental.pallas import tpu as pltpu


def _copy_kernel(x_ref, o_ref):
    # Identity copy of the current tile (the entire "work" of a view/reshape).
    o_ref[...] = x_ref[...]


def _device_kind():
    try:
        return jax.devices()[0].device_kind.lower()
    except Exception:
        return ""


def _sublane_multiple(dtype):
    # Sub-32-bit dtypes pack along sublanes: 8 rows for f32, 16 for bf16/f16,
    # 32 for int8/fp8 -> keeps stores unmasked and vregs fully occupied.
    itemsize = jnp.dtype(dtype).itemsize
    return max(8, 32 // itemsize)


def _choose_slab(total, sublane):
    """Pick a lane-dense (R, C) factorization of `total`.

    Prefers C a multiple of 128 AND R a multiple of the packed sublane count
    (full vreg occupancy, unmasked vst). Falls back to any C multiple of 128,
    else None (caller uses the metadata-only reshape)."""
    candidates = (32768, 16384, 8192, 4096, 2048, 1024, 512, 256, 128)
    for c in candidates:
        if total % c == 0 and (total // c) % sublane == 0:
            return total // c, c
    for c in candidates:
        if total % c == 0:
            # R not sublane-aligned: correct but last tile may be masked.
            return total // c, c
    return None, None


def _materialized_copy(x, out_shape):
    """Tiled, pipelined Pallas identity copy -> new buffer with `out_shape`."""
    total = int(math.prod(x.shape))
    itemsize = jnp.dtype(x.dtype).itemsize
    sublane = _sublane_multiple(x.dtype)

    R, C = _choose_slab(total, sublane)
    if R is None:
        # Not lane-alignable: metadata reshape is exact (and faster) anyway.
        return jnp.reshape(x, out_shape)

    kind = _device_kind()
    is_v5 = "v5" in kind
    is_v7 = "v7" in kind

    # Tile target: ~4 MiB on v6e/v7x (amortizes ~0.35us/grid-step overhead at
    # high HBM BW), ~2 MiB on v5e / unknown chips (stays well inside v5e's
    # 16 MiB scoped-VMEM default even before we raise the limit).
    tile_bytes = (2 * 1024 * 1024) if (is_v5 or not kind) else (4 * 1024 * 1024)
    target_rows = max(sublane, tile_bytes // (C * itemsize))
    tr = min(R, max(sublane, (target_rows // sublane) * sublane))

    # 2 arrays (in + out) x 2 buffers (double-buffered) x tile, plus headroom.
    vmem_limit = (40 << 20) if tile_bytes >= (4 * 1024 * 1024) else (32 << 20)

    grid = (pl.cdiv(R, tr),)

    # On v7x actually split the row grid across both TensorCores; plain
    # "parallel" elsewhere (near-zero codegen impact on single-TC chips).
    if is_v7 and grid[0] >= 2:
        dim_sem = (pltpu.CORE_PARALLEL,)
    else:
        dim_sem = ("parallel",)

    # Row-major flatten (same memory-order semantics as torch .view()), then
    # the lane-dense slab. Metadata-only for default-layout contiguous arrays.
    # TODO(synk): if xprof shows a hidden layout copy here for exotic input
    # layouts, take the metadata-reshape path instead.
    x2 = x.reshape(-1).reshape(R, C)

    out2 = pl.pallas_call(
        _copy_kernel,
        out_shape=jax.ShapeDtypeStruct((R, C), x.dtype),
        grid_spec=pl.GridSpec(
            grid=grid,
            in_specs=[pl.BlockSpec((tr, C), lambda i: (i, 0))],
            out_specs=pl.BlockSpec((tr, C), lambda i: (i, 0)),
        ),
        # Donate the input slab as the output buffer: no extra HBM allocation,
        # matches torch .view storage-sharing semantics. (Safe: identity copy,
        # per-element src == dst.)
        input_output_aliases={0: 0},
        compiler_params=pltpu.CompilerParams(
            dimension_semantics=dim_sem,
            vmem_limit_bytes=vmem_limit,
        ),
        cost_estimate=pl.CostEstimate(
            flops=0,
            transcendentals=0,
            bytes_accessed=2 * total * itemsize,
        ),
    )(x2)

    # Final metadata-only reshape to the requested target shape.
    return out2.reshape(out_shape)


def reshape_forward(x, new_shape, force_copy=False):
    """Equivalent of torch `x.view(-1, *new_shape)`.

    Default (hot) path: metadata-only reshape — zero HBM traffic, exactly what
    torch .view is. `force_copy=True` materializes the result via the Pallas
    identity-copy kernel (donates x's slab; do not reuse x afterwards)."""
    flat = int(math.prod(new_shape))
    total = int(math.prod(x.shape))
    assert flat > 0 and total % flat == 0, (
        "input size not divisible by prod(new_shape)")
    batch = total // flat
    out_shape = (batch,) + tuple(new_shape)

    if not force_copy:
        # Hot path: no kernel at all (review optimization #1).
        return jnp.reshape(x, out_shape)

    return _materialized_copy(x, out_shape)


class Reshape:
    """JAX/Pallas equivalent of the PyTorch Reshape nn.Module."""

    def __init__(self, new_shape, force_copy=False):
        self.new_shape = tuple(new_shape)
        self.force_copy = force_copy

    def __call__(self, x):
        return reshape_forward(x, self.new_shape, force_copy=self.force_copy)


if __name__ == "__main__":
    key = jax.random.PRNGKey(0)
    # Small NCHW-ish input consistent with an autoencoder feature map.
    x = jax.random.normal(key, (2, 4, 16, 16), dtype=jnp.float32)

    # Target shape for the Reshape module: view(-1, 4, 256)
    new_shape = (4, 256)

    # Reference computed FIRST (the copy path donates buffers).
    y_ref = jnp.reshape(x, (-1,) + new_shape)

    # 1) Default hot path: metadata-only reshape (no kernel).
    y_meta = Reshape(new_shape)(x)
    y_meta = jax.block_until_ready(y_meta)
    assert y_meta.shape == y_ref.shape, (y_meta.shape, y_ref.shape)
    assert bool(jnp.array_equal(y_meta, y_ref)), "metadata path mismatch"

    # 2) Explicit materialized-copy path: exercises the Pallas kernel once.
    y_copy = Reshape(new_shape, force_copy=True)(x)
    y_copy = jax.block_until_ready(y_copy)
    assert y_copy.shape == y_ref.shape, (y_copy.shape, y_ref.shape)
    assert bool(jnp.array_equal(y_copy, y_ref)), "Pallas copy path mismatch"

    print("KERNEL_OK")
</pallas_src>

<mosaic_0001>
module attributes {stable_mosaic.version = 11 : i64} {
  func.func @_copy_kernel(%arg0: i32, %arg1: memref<8x256xf32, #tpu.memory_space<vmem>>, %arg2: memref<8x256xf32, #tpu.memory_space<vmem>>) attributes {dimension_semantics = [#tpu.dimension_semantics<parallel>], iteration_bounds = array<i64: 1>, scalar_prefetch = 0 : i64, scratch_operands = 0 : i64, tpu.core_type = #tpu.core_type<tc>, window_params = [{transform_indices = @transform_0, window_bounds = array<i64: 8, 256>}, {transform_indices = @transform_1, window_bounds = array<i64: 8, 256>}]} {
    %c0 = arith.constant 0 : index
    %c0_0 = arith.constant 0 : index
    %0 = vector.load %arg1[%c0, %c0_0] : memref<8x256xf32, #tpu.memory_space<vmem>>, vector<8x256xf32>
    %c0_1 = arith.constant 0 : index
    %c0_2 = arith.constant 0 : index
    %1 = vector.load %arg2[%c0_1, %c0_2] : memref<8x256xf32, #tpu.memory_space<vmem>>, vector<8x256xf32>
    tpu.vector_store %arg2[%c0_1, %c0_2], %0 {strides = array<i32>} : memref<8x256xf32, #tpu.memory_space<vmem>>, vector<8x256xf32>,
    return
  }
  func.func @transform_0(%arg0: i32) -> (i32, i32) {
    %c0_i32 = arith.constant 0 : i32
    %c0_i32_0 = arith.constant 0 : i32
    return %arg0, %c0_i32 : i32, i32
  }
  func.func @transform_1(%arg0: i32) -> (i32, i32) {
    %c0_i32 = arith.constant 0 : i32
    %c0_i32_0 = arith.constant 0 : i32
    return %arg0, %c0_i32 : i32, i32
  }
}

</mosaic_0001>

<bundles_post_ra>
// kernel: tpu_custom_call.1
= control target key start
LH: loop header
LB: loop body
LE: loop exit
PB: predicated region body
PF: predicated region fallthrough
CT: control target
= control target key end

     0   :  { %6 = vsyncpa [#allocation3], 0  ;;  %s126_s0 = inlined_call_operand.hbm [shape: f32[8,256], index: 0, kind: input, shape index: {}, may-alias: {0,1}]   ;;  %s127_s1 = inlined_call_operand.hbm [shape: f32[8,256], index: 1, kind: output, shape index: {}, may-alias: {0,1}]  }
   0x1   :  { %7 = vsyncpa [#allocation4], 0  ;;  %s90_s6 = smov [#allocation2]   ;;  %s42_s10 = scalar_lea.hbm %s126_s0, 256 }
   0x2   :  { %s14_s7 = sshll.u32 %s90_s6, 4  ;;  %p43_p0 = scmp.ne.s32.totalorder %s126_s0, %s42_s10  ;;  %s15_s7 = int_to_ptr.vmem [resolvable:$true] %s14_s7 }
   0x3   :  { %p46_p1 = scmp.lt.u32.totalorder %s42_s10, %s126_s0 }
   0x5   :  { %p48_p2 = pnand %p46_p1, %p43_p0 }
   0x7   :  { %51 = shalt.err (!%p48_p2)
}
   0x8   :  { %s52_s15 = scalar_lea.vmem %s15_s7, 256  ;;  %p57_p4 = scmp.lt.s32.totalorder %s15_s7, %s15_s7 }
   0x9   :  { %p53_p3 = scmp.ne.s32.totalorder %s15_s7, %s52_s15  ;;  %p58_p5 = scmp.lt.s32.totalorder %s52_s15, %s52_s15 }
   0xb   :  { %p59_p6 = por %p58_p5, %p57_p4 }
   0xd   :  { %p60_p7 = pnand %p59_p6, %p53_p3 }
   0xf   :  { %63 = shalt.err (!%p60_p7)
}
  0x10   :  { %17 = dma.hbm_to_vmem [thread:$0]  %s126_s0, 256, %s15_s7, [#allocation3]  }
  0x11   :  { %86 = dma.done.wait [#allocation3], 256  }
  0x12   :  { %87 = vsyncadd [#allocation3], 4294967040  ;;  %s91_s18 = smov [#allocation5]   ;;  %v21_v0 = vld [vmem:[#allocation2] sm:$0xff]  ;;  %v22_v1 = vld [vmem:[#allocation2 + $0x8] sm:$0xff] }
  0x13   :  { %s31_s19 = sshll.u32 %s91_s18, 4  ;;  %23 = vst [vmem:[#allocation5] sm:$0xff] %v21_v0  ;;  %24 = vst [vmem:[#allocation5 + $0x8] sm:$0xff] %v22_v1  ;;  %s32_s19 = int_to_ptr.vmem [resolvable:$true] %s31_s19 }
  0x14   :  { %s64_s20 = scalar_lea.vmem %s32_s19, 256  ;;  %p69_p9 = scmp.lt.s32.totalorder %s32_s19, %s32_s19 }
  0x15   :  { %p65_p8 = scmp.ne.s32.totalorder %s32_s19, %s64_s20  ;;  %p70_p10 = scmp.lt.s32.totalorder %s64_s20, %s64_s20 }
  0x17   :  { %p71_p11 = por %p70_p10, %p69_p9 }
  0x19   :  { %p72_p12 = pnand %p71_p11, %p65_p8 }
  0x1b   :  { %75 = shalt.err (!%p72_p12)
}
  0x1c   :  { %s76_s0 = scalar_lea.hbm %s127_s1, 256 }
  0x1d   :  { %p77_p13 = scmp.ne.s32.totalorder %s127_s1, %s76_s0  ;;  %p80_p0 = scmp.lt.u32.totalorder %s76_s0, %s127_s1 }
  0x1f   :  { %p82_p1 = pnand %p80_p0, %p77_p13 }
  0x21   :  { %85 = shalt.err (!%p82_p1)
}
  0x22   :  { %34 = dma.vmem_to_hbm [thread:$0]  %s32_s19, 256, %s127_s1, [#allocation4]  }
  0x23   :  { %88 = dma.done.wait [#allocation4], 256  }
  0x24   :  { %89 = vsyncadd [#allocation4], 4294967040 }
  0x25   :  { %38 = vsyncpa [#allocation3], 1 }
  0x26   :  { %39 = vsyncpa [#allocation4], 1 }

</bundles_post_ra>
